<compile_context>
chip_gen: v7x
topology: tpu7x:2x2x1
jax: 0.10.0
libtpu: 0.0.40
codegen_flags: <defaults>
</compile_context>

<pallas_src>
import functools
import math

import jax
import jax.numpy as jnp
from jax import lax
from jax.experimental import pallas as pl
from jax.experimental.pallas import tpu as pltpu


def _dwconv_kernel(x_ref, w_ref, b_ref, o_ref, *scratch, H, W, K, TH):
    # x_ref : (1, H, W, Ct)   unpadded input tile (one batch, one channel chunk)
    # w_ref : (K*K, Ct)       depthwise filter taps, tap-major, channel last
    # b_ref : (1, Ct)         bias
    # o_ref : (1, H, W, Ct)
    # scratch (only when K > 1): (Hp, Wp_al, Ct) VMEM halo buffer
    pad = K // 2
    Ct = o_ref.shape[-1]
    scr_ref = scratch[0] if scratch else None

    if pad > 0:
        Hp = H + 2 * pad
        Wp_al = scr_ref.shape[1]
        # Zero only the halo border; the interior is fully overwritten below.
        zrow = jnp.zeros((pad, Wp_al, Ct), scr_ref.dtype)
        scr_ref[0:pad, :, :] = zrow
        scr_ref[pad + H:Hp, :, :] = zrow
        scr_ref[pad:pad + H, 0:pad, :] = jnp.zeros((H, pad, Ct), scr_ref.dtype)
        scr_ref[pad:pad + H, pad + W:Wp_al, :] = jnp.zeros(
            (H, Wp_al - (pad + W), Ct), scr_ref.dtype)
        # Copy the unpadded interior into the halo buffer (VMEM -> VMEM).
        scr_ref[pad:pad + H, pad:pad + W, :] = x_ref[0]

    # Hoist tap weights / bias out of the row loop (loaded once per grid step).
    w_all = w_ref[...].astype(jnp.float32)   # (K*K, Ct)
    bias_v = b_ref[0].astype(jnp.float32)    # (Ct,)

    def window(h0, kh, kw):
        if pad == 0:
            # K == 1: no halo needed, read straight from the input block.
            return x_ref[0, pl.ds(h0, TH), :, :]
        return scr_ref[pl.ds(h0 + kh, TH), pl.ds(kw, W), :]

    num_row_tiles = H // TH

    def row_body(r, carry):
        h0 = pl.multiple_of(r * TH, TH)
        # Deferred bias: initialize the accumulator from the first tap.
        acc = window(h0, 0, 0).astype(jnp.float32) * w_all[0]
        for kh in range(K):
            for kw in range(K):
                if kh == 0 and kw == 0:
                    continue
                win = window(h0, kh, kw).astype(jnp.float32)
                acc = acc + win * w_all[kh * K + kw]
        acc = acc + bias_v
        o_ref[0, pl.ds(h0, TH), :, :] = acc.astype(o_ref.dtype)
        return carry

    lax.fori_loop(0, num_row_tiles, row_body, 0)


def _pick_row_tile(H, W, Ct, max_vregs=32):
    """Largest divisor of H whose (TH, W, Ct) f32 accumulator fits ~max_vregs."""
    vregs_per_row = math.ceil(W / 8) * math.ceil(Ct / 128)
    target = max(1, max_vregs // max(1, vregs_per_row))
    for t in range(min(target, H), 0, -1):
        if H % t == 0:
            return t
    return 1


def dwconv_pallas(x, weight, bias, kernel_size):
    """x: (B, N, C); weight: (C, 1, K, K) (PyTorch layout); bias: (C,)."""
    B, N, C = x.shape
    H = W = int(math.sqrt(N))
    assert H * W == N, "N must be a perfect square"
    K = int(kernel_size)
    assert K % 2 == 1, "kernel_size must be odd (padding = k//2 preserves H, W)"
    pad = K // 2

    # (B, N, C) -> NHWC (B, H, W, C); faithful to x.transpose(1,2).view(B,C,H,W).
    x_nhwc = x.reshape(B, H, W, C)

    # Lane-dense channels: pad C up to a multiple of 128 only when required
    # (realistic MoWE dims, e.g. C=768, need no pad => no extra HBM pass).
    LANE = 128
    Cp = ((C + LANE - 1) // LANE) * LANE
    if Cp != C:
        x_nhwc = jnp.pad(x_nhwc, ((0, 0), (0, 0), (0, 0), (0, Cp - C)))
    Ct = 256 if Cp % 256 == 0 else 128  # channel tile (lane dense, VMEM friendly)

    # (C, 1, K, K) -> (K*K, C) tap-major, channel-last; pad channels to Cp.
    w_taps = jnp.transpose(weight[:, 0, :, :], (1, 2, 0)).reshape(K * K, C)
    b2d = bias.reshape(1, C)
    if Cp != C:
        w_taps = jnp.pad(w_taps, ((0, 0), (0, Cp - C)))
        b2d = jnp.pad(b2d, ((0, 0), (0, Cp - C)))

    TH = _pick_row_tile(H, W, Ct)

    Hp = H + 2 * pad
    Wp = W + 2 * pad
    Wp_al = ((Wp + 7) // 8) * 8  # sublane-align the halo buffer width
    scratch_shapes = []
    if pad > 0:
        scratch_shapes = [pltpu.VMEM((Hp, Wp_al, Ct), x.dtype)]

    kernel = functools.partial(_dwconv_kernel, H=H, W=W, K=K, TH=TH)

    out_nhwc = pl.pallas_call(
        kernel,
        out_shape=jax.ShapeDtypeStruct((B, H, W, Cp), x.dtype),
        grid_spec=pltpu.PrefetchScalarGridSpec(
            num_scalar_prefetch=0,
            grid=(B, Cp // Ct),
            in_specs=[
                pl.BlockSpec((1, H, W, Ct), lambda b, c: (b, 0, 0, c)),
                pl.BlockSpec((K * K, Ct), lambda b, c: (0, c)),
                pl.BlockSpec((1, Ct), lambda b, c: (0, c)),
            ],
            out_specs=pl.BlockSpec((1, H, W, Ct), lambda b, c: (b, 0, 0, c)),
            scratch_shapes=scratch_shapes,
        ),
        compiler_params=pltpu.CompilerParams(
            dimension_semantics=("parallel", "parallel")),
    )(x_nhwc, w_taps, b2d)

    if Cp != C:
        out_nhwc = out_nhwc[..., :C]
    # NHWC -> (B, N, C), matches x.flatten(2).transpose(1, 2).
    return out_nhwc.reshape(B, N, C)


def dwconv_reference(x, weight, bias, kernel_size):
    """Pure-jnp reference of the same depthwise conv (NHWC)."""
    B, N, C = x.shape
    H = W = int(math.sqrt(N))
    K = int(kernel_size)
    pad = K // 2
    x_nhwc = x.reshape(B, H, W, C).astype(jnp.float32)
    xpad = jnp.pad(x_nhwc, ((0, 0), (pad, pad), (pad, pad), (0, 0)))
    out = jnp.broadcast_to(bias.astype(jnp.float32), (B, H, W, C))
    for kh in range(K):
        for kw in range(K):
            tap = weight[:, 0, kh, kw].astype(jnp.float32)  # (C,)
            out = out + xpad[:, kh:kh + H, kw:kw + W, :] * tap
    return out.reshape(B, N, C).astype(x.dtype)


if __name__ == "__main__":
    key = jax.random.PRNGKey(0)
    kx, kw, kb, kw1, kb1 = jax.random.split(key, 5)

    # Small, deterministic problem: B=2, spatial 8x8 -> N=64, C(dim)=32, K=3.
    B, H, W, C = 2, 8, 8, 32
    N = H * W
    K = 3  # DWConv(dim=C, kernel_size=3); padding = K//2 preserves H, W

    x = jax.random.normal(kx, (B, N, C), dtype=jnp.float32)
    # nn.Conv2d(C, C, K, groups=C) weight shape: (C, 1, K, K); bias: (C,)
    weight = jax.random.normal(kw, (C, 1, K, K), dtype=jnp.float32) * 0.1
    bias = jax.random.normal(kb, (C,), dtype=jnp.float32) * 0.1

    out = jax.block_until_ready(dwconv_pallas(x, weight, bias, K))
    ref = dwconv_reference(x, weight, bias, K)
    assert out.shape == (B, N, C), out.shape
    assert jnp.allclose(out, ref, atol=1e-5, rtol=1e-5), \
        float(jnp.max(jnp.abs(out - ref)))

    # Also exercise the module's default kernel_size=1 (no-halo fast path).
    K1 = 1
    weight1 = jax.random.normal(kw1, (C, 1, K1, K1), dtype=jnp.float32) * 0.1
    bias1 = jax.random.normal(kb1, (C,), dtype=jnp.float32) * 0.1
    out1 = jax.block_until_ready(dwconv_pallas(x, weight1, bias1, K1))
    ref1 = dwconv_reference(x, weight1, bias1, K1)
    assert jnp.allclose(out1, ref1, atol=1e-5, rtol=1e-5), \
        float(jnp.max(jnp.abs(out1 - ref1)))

    print("KERNEL_OK")
</pallas_src>

<mosaic_0001>
module attributes {stable_mosaic.version = 11 : i64} {
  func.func @_dwconv_kernel(%arg0: i32, %arg1: i32, %arg2: memref<1x8x8x128xf32, #tpu.memory_space<vmem>>, %arg3: memref<9x128xf32, #tpu.memory_space<vmem>>, %arg4: memref<1x128xf32, #tpu.memory_space<vmem>>, %arg5: memref<1x8x8x128xf32, #tpu.memory_space<vmem>>, %arg6: memref<10x16x128xf32, #tpu.memory_space<vmem>>) attributes {dimension_semantics = [#tpu.dimension_semantics<parallel>, #tpu.dimension_semantics<parallel>], iteration_bounds = array<i64: 2, 1>, scalar_prefetch = 0 : i64, scratch_operands = 1 : i64, tpu.core_type = #tpu.core_type<tc>, window_params = [{transform_indices = @transform_0, window_bounds = array<i64: 1, 8, 8, 128>}, {transform_indices = @transform_1, window_bounds = array<i64: 9, 128>}, {transform_indices = @transform_2, window_bounds = array<i64: 1, 128>}, {transform_indices = @transform_3, window_bounds = array<i64: 1, 8, 8, 128>}]} {
    %cst = arith.constant 0.000000e+00 : f32
    %0 = vector.broadcast %cst : f32 to vector<1x16x128xf32>
    %c0 = arith.constant 0 : index
    %c0_0 = arith.constant 0 : index
    %c0_1 = arith.constant 0 : index
    %1 = vector.load %arg6[%c0, %c0_0, %c0_1] : memref<10x16x128xf32, #tpu.memory_space<vmem>>, vector<1x16x128xf32>
    tpu.vector_store %arg6[%c0, %c0_0, %c0_1], %0 {strides = array<i32>} : memref<10x16x128xf32, #tpu.memory_space<vmem>>, vector<1x16x128xf32>,
    %c9 = arith.constant 9 : index
    %c0_2 = arith.constant 0 : index
    %c0_3 = arith.constant 0 : index
    %2 = vector.load %arg6[%c9, %c0_2, %c0_3] : memref<10x16x128xf32, #tpu.memory_space<vmem>>, vector<1x16x128xf32>
    tpu.vector_store %arg6[%c9, %c0_2, %c0_3], %0 {strides = array<i32>} : memref<10x16x128xf32, #tpu.memory_space<vmem>>, vector<1x16x128xf32>,
    %cst_4 = arith.constant 0.000000e+00 : f32
    %3 = vector.broadcast %cst_4 : f32 to vector<8x1x128xf32>
    %c1 = arith.constant 1 : index
    %c0_5 = arith.constant 0 : index
    %c0_6 = arith.constant 0 : index
    %4 = vector.load %arg6[%c1, %c0_5, %c0_6] : memref<10x16x128xf32, #tpu.memory_space<vmem>>, vector<8x1x128xf32>
    tpu.vector_store %arg6[%c1, %c0_5, %c0_6], %3 {strides = array<i32>} : memref<10x16x128xf32, #tpu.memory_space<vmem>>, vector<8x1x128xf32>,
    %cst_7 = arith.constant 0.000000e+00 : f32
    %5 = vector.broadcast %cst_7 : f32 to vector<8x7x128xf32>
    %c1_8 = arith.constant 1 : index
    %c9_9 = arith.constant 9 : index
    %c0_10 = arith.constant 0 : index
    %6 = vector.load %arg6[%c1_8, %c9_9, %c0_10] : memref<10x16x128xf32, #tpu.memory_space<vmem>>, vector<8x7x128xf32>
    tpu.vector_store %arg6[%c1_8, %c9_9, %c0_10], %5 {strides = array<i32>} : memref<10x16x128xf32, #tpu.memory_space<vmem>>, vector<8x7x128xf32>,
    %c0_11 = arith.constant 0 : index
    %c0_12 = arith.constant 0 : index
    %c0_13 = arith.constant 0 : index
    %c0_14 = arith.constant 0 : index
    %7 = vector.load %arg2[%c0_11, %c0_12, %c0_13, %c0_14] : memref<1x8x8x128xf32, #tpu.memory_space<vmem>>, vector<1x8x8x128xf32>
    %8 = vector.shape_cast %7 : vector<1x8x8x128xf32> to vector<8x8x128xf32>
    %c1_15 = arith.constant 1 : index
    %c1_16 = arith.constant 1 : index
    %c0_17 = arith.constant 0 : index
    %9 = vector.load %arg6[%c1_15, %c1_16, %c0_17] : memref<10x16x128xf32, #tpu.memory_space<vmem>>, vector<8x8x128xf32>
    tpu.vector_store %arg6[%c1_15, %c1_16, %c0_17], %8 {strides = array<i32>} : memref<10x16x128xf32, #tpu.memory_space<vmem>>, vector<8x8x128xf32>,
    %c0_18 = arith.constant 0 : index
    %c0_19 = arith.constant 0 : index
    %10 = vector.load %arg3[%c0_18, %c0_19] : memref<9x128xf32, #tpu.memory_space<vmem>>, vector<9x128xf32>
    %c0_20 = arith.constant 0 : index
    %c0_21 = arith.constant 0 : index
    %11 = vector.load %arg4[%c0_20, %c0_21] : memref<1x128xf32, #tpu.memory_space<vmem>>, vector<1x128xf32>
    %12 = vector.shape_cast %11 : vector<1x128xf32> to vector<128xf32>
    %c0_i32 = arith.constant 0 : i32
    %c8_i32 = arith.constant 8 : i32
    %13 = arith.muli %c0_i32, %c8_i32 : i32
    %14 = tpu.assume_multiple %13, 8 : i32
    %c0_i32_22 = arith.constant 0 : i32
    %15 = arith.addi %14, %c0_i32_22 : i32
    %16 = arith.index_cast %15 : i32 to index
    %c0_23 = arith.constant 0 : index
    %c0_24 = arith.constant 0 : index
    %17 = vector.load %arg6[%16, %c0_23, %c0_24] : memref<10x16x128xf32, #tpu.memory_space<vmem>>, vector<8x8x128xf32>
    %18 = vector.extract_strided_slice %10 {offsets = [0, 0], sizes = [1, 128], strides = [1, 1]} : vector<9x128xf32> to vector<1x128xf32>
    %19 = vector.shape_cast %18 : vector<1x128xf32> to vector<128xf32>
    %20 = vector.shape_cast %19 : vector<128xf32> to vector<1x1x128xf32>
    %21 = vector.broadcast %20 : vector<1x1x128xf32> to vector<8x8x128xf32>
    %22 = arith.mulf %17, %21 : vector<8x8x128xf32>
    %c0_i32_25 = arith.constant 0 : i32
    %23 = arith.addi %14, %c0_i32_25 : i32
    %24 = arith.index_cast %23 : i32 to index
    %c1_26 = arith.constant 1 : index
    %c0_27 = arith.constant 0 : index
    %25 = vector.load %arg6[%24, %c1_26, %c0_27] : memref<10x16x128xf32, #tpu.memory_space<vmem>>, vector<8x8x128xf32>
    %26 = vector.extract_strided_slice %10 {offsets = [1, 0], sizes = [1, 128], strides = [1, 1]} : vector<9x128xf32> to vector<1x128xf32>
    %27 = vector.shape_cast %26 : vector<1x128xf32> to vector<128xf32>
    %28 = vector.shape_cast %27 : vector<128xf32> to vector<1x1x128xf32>
    %29 = vector.broadcast %28 : vector<1x1x128xf32> to vector<8x8x128xf32>
    %30 = arith.mulf %25, %29 : vector<8x8x128xf32>
    %31 = arith.addf %22, %30 : vector<8x8x128xf32>
    %c0_i32_28 = arith.constant 0 : i32
    %32 = arith.addi %14, %c0_i32_28 : i32
    %33 = arith.index_cast %32 : i32 to index
    %c2 = arith.constant 2 : index
    %c0_29 = arith.constant 0 : index
    %34 = vector.load %arg6[%33, %c2, %c0_29] : memref<10x16x128xf32, #tpu.memory_space<vmem>>, vector<8x8x128xf32>
    %35 = vector.extract_strided_slice %10 {offsets = [2, 0], sizes = [1, 128], strides = [1, 1]} : vector<9x128xf32> to vector<1x128xf32>
    %36 = vector.shape_cast %35 : vector<1x128xf32> to vector<128xf32>
    %37 = vector.shape_cast %36 : vector<128xf32> to vector<1x1x128xf32>
    %38 = vector.broadcast %37 : vector<1x1x128xf32> to vector<8x8x128xf32>
    %39 = arith.mulf %34, %38 : vector<8x8x128xf32>
    %40 = arith.addf %31, %39 : vector<8x8x128xf32>
    %c1_i32 = arith.constant 1 : i32
    %41 = arith.addi %14, %c1_i32 : i32
    %42 = arith.index_cast %41 : i32 to index
    %c0_30 = arith.constant 0 : index
    %c0_31 = arith.constant 0 : index
    %43 = vector.load %arg6[%42, %c0_30, %c0_31] : memref<10x16x128xf32, #tpu.memory_space<vmem>>, vector<8x8x128xf32>
    %44 = vector.extract_strided_slice %10 {offsets = [3, 0], sizes = [1, 128], strides = [1, 1]} : vector<9x128xf32> to vector<1x128xf32>
    %45 = vector.shape_cast %44 : vector<1x128xf32> to vector<128xf32>
    %46 = vector.shape_cast %45 : vector<128xf32> to vector<1x1x128xf32>
    %47 = vector.broadcast %46 : vector<1x1x128xf32> to vector<8x8x128xf32>
    %48 = arith.mulf %43, %47 : vector<8x8x128xf32>
    %49 = arith.addf %40, %48 : vector<8x8x128xf32>
    %c1_i32_32 = arith.constant 1 : i32
    %50 = arith.addi %14, %c1_i32_32 : i32
    %51 = arith.index_cast %50 : i32 to index
    %c1_33 = arith.constant 1 : index
    %c0_34 = arith.constant 0 : index
    %52 = vector.load %arg6[%51, %c1_33, %c0_34] : memref<10x16x128xf32, #tpu.memory_space<vmem>>, vector<8x8x128xf32>
    %53 = vector.extract_strided_slice %10 {offsets = [4, 0], sizes = [1, 128], strides = [1, 1]} : vector<9x128xf32> to vector<1x128xf32>
    %54 = vector.shape_cast %53 : vector<1x128xf32> to vector<128xf32>
    %55 = vector.shape_cast %54 : vector<128xf32> to vector<1x1x128xf32>
    %56 = vector.broadcast %55 : vector<1x1x128xf32> to vector<8x8x128xf32>
    %57 = arith.mulf %52, %56 : vector<8x8x128xf32>
    %58 = arith.addf %49, %57 : vector<8x8x128xf32>
    %c1_i32_35 = arith.constant 1 : i32
    %59 = arith.addi %14, %c1_i32_35 : i32
    %60 = arith.index_cast %59 : i32 to index
    %c2_36 = arith.constant 2 : index
    %c0_37 = arith.constant 0 : index
    %61 = vector.load %arg6[%60, %c2_36, %c0_37] : memref<10x16x128xf32, #tpu.memory_space<vmem>>, vector<8x8x128xf32>
    %62 = vector.extract_strided_slice %10 {offsets = [5, 0], sizes = [1, 128], strides = [1, 1]} : vector<9x128xf32> to vector<1x128xf32>
    %63 = vector.shape_cast %62 : vector<1x128xf32> to vector<128xf32>
    %64 = vector.shape_cast %63 : vector<128xf32> to vector<1x1x128xf32>
    %65 = vector.broadcast %64 : vector<1x1x128xf32> to vector<8x8x128xf32>
    %66 = arith.mulf %61, %65 : vector<8x8x128xf32>
    %67 = arith.addf %58, %66 : vector<8x8x128xf32>
    %c2_i32 = arith.constant 2 : i32
    %68 = arith.addi %14, %c2_i32 : i32
    %69 = arith.index_cast %68 : i32 to index
    %c0_38 = arith.constant 0 : index
    %c0_39 = arith.constant 0 : index
    %70 = vector.load %arg6[%69, %c0_38, %c0_39] : memref<10x16x128xf32, #tpu.memory_space<vmem>>, vector<8x8x128xf32>
    %71 = vector.extract_strided_slice %10 {offsets = [6, 0], sizes = [1, 128], strides = [1, 1]} : vector<9x128xf32> to vector<1x128xf32>
    %72 = vector.shape_cast %71 : vector<1x128xf32> to vector<128xf32>
    %73 = vector.shape_cast %72 : vector<128xf32> to vector<1x1x128xf32>
    %74 = vector.broadcast %73 : vector<1x1x128xf32> to vector<8x8x128xf32>
    %75 = arith.mulf %70, %74 : vector<8x8x128xf32>
    %76 = arith.addf %67, %75 : vector<8x8x128xf32>
    %c2_i32_40 = arith.constant 2 : i32
    %77 = arith.addi %14, %c2_i32_40 : i32
    %78 = arith.index_cast %77 : i32 to index
    %c1_41 = arith.constant 1 : index
    %c0_42 = arith.constant 0 : index
    %79 = vector.load %arg6[%78, %c1_41, %c0_42] : memref<10x16x128xf32, #tpu.memory_space<vmem>>, vector<8x8x128xf32>
    %80 = vector.extract_strided_slice %10 {offsets = [7, 0], sizes = [1, 128], strides = [1, 1]} : vector<9x128xf32> to vector<1x128xf32>
    %81 = vector.shape_cast %80 : vector<1x128xf32> to vector<128xf32>
    %82 = vector.shape_cast %81 : vector<128xf32> to vector<1x1x128xf32>
    %83 = vector.broadcast %82 : vector<1x1x128xf32> to vector<8x8x128xf32>
    %84 = arith.mulf %79, %83 : vector<8x8x128xf32>
    %85 = arith.addf %76, %84 : vector<8x8x128xf32>
    %c2_i32_43 = arith.constant 2 : i32
    %86 = arith.addi %14, %c2_i32_43 : i32
    %87 = arith.index_cast %86 : i32 to index
    %c2_44 = arith.constant 2 : index
    %c0_45 = arith.constant 0 : index
    %88 = vector.load %arg6[%87, %c2_44, %c0_45] : memref<10x16x128xf32, #tpu.memory_space<vmem>>, vector<8x8x128xf32>
    %89 = vector.extract_strided_slice %10 {offsets = [8, 0], sizes = [1, 128], strides = [1, 1]} : vector<9x128xf32> to vector<1x128xf32>
    %90 = vector.shape_cast %89 : vector<1x128xf32> to vector<128xf32>
    %91 = vector.shape_cast %90 : vector<128xf32> to vector<1x1x128xf32>
    %92 = vector.broadcast %91 : vector<1x1x128xf32> to vector<8x8x128xf32>
    %93 = arith.mulf %88, %92 : vector<8x8x128xf32>
    %94 = arith.addf %85, %93 : vector<8x8x128xf32>
    %95 = vector.shape_cast %12 : vector<128xf32> to vector<1x1x128xf32>
    %96 = vector.broadcast %95 : vector<1x1x128xf32> to vector<8x8x128xf32>
    %97 = arith.addf %94, %96 : vector<8x8x128xf32>
    %c0_46 = arith.constant 0 : index
    %98 = arith.index_cast %14 : i32 to index
    %c0_47 = arith.constant 0 : index
    %c0_48 = arith.constant 0 : index
    %99 = vector.load %arg5[%c0_46, %98, %c0_47, %c0_48] : memref<1x8x8x128xf32, #tpu.memory_space<vmem>>, vector<1x8x8x128xf32>
    %100 = vector.shape_cast %99 : vector<1x8x8x128xf32> to vector<8x8x128xf32>
    %101 = vector.shape_cast %97 : vector<8x8x128xf32> to vector<1x8x8x128xf32>
    tpu.vector_store %arg5[%c0_46, %98, %c0_47, %c0_48], %101 {strides = array<i32>} : memref<1x8x8x128xf32, #tpu.memory_space<vmem>>, vector<1x8x8x128xf32>,
    %c1_i32_49 = arith.constant 1 : i32
    return
  }
  func.func @transform_0(%arg0: i32, %arg1: i32) -> (i32, i32, i32, i32) {
    %c0_i32 = arith.constant 0 : i32
    %c0_i32_0 = arith.constant 0 : i32
    %c0_i32_1 = arith.constant 0 : i32
    return %arg0, %c0_i32, %c0_i32_0, %arg1 : i32, i32, i32, i32
  }
  func.func @transform_1(%arg0: i32, %arg1: i32) -> (i32, i32) {
    %c0_i32 = arith.constant 0 : i32
    %c0_i32_0 = arith.constant 0 : i32
    return %c0_i32, %arg1 : i32, i32
  }
  func.func @transform_2(%arg0: i32, %arg1: i32) -> (i32, i32) {
    %c0_i32 = arith.constant 0 : i32
    %c0_i32_0 = arith.constant 0 : i32
    return %c0_i32, %arg1 : i32, i32
  }
  func.func @transform_3(%arg0: i32, %arg1: i32) -> (i32, i32, i32, i32) {
    %c0_i32 = arith.constant 0 : i32
    %c0_i32_0 = arith.constant 0 : i32
    %c0_i32_1 = arith.constant 0 : i32
    return %arg0, %c0_i32, %c0_i32_0, %arg1 : i32, i32, i32, i32
  }
}

</mosaic_0001>

<bundles_post_ra>
// kernel: tpu_custom_call.1
= control target key start
LH: loop header
LB: loop body
LE: loop exit
PB: predicated region body
PF: predicated region fallthrough
CT: control target
= control target key end

     0   :  { %8 = vsyncpa [#allocation4], 0  ;;  %s1344_s0 = inlined_call_operand.hbm [shape: f32[2,8,8,128], index: 0, kind: input, shape index: {}]   ;;  %s1345_s1 = inlined_call_operand.hbm [shape: f32[9,128], index: 1, kind: input, shape index: {}]   ;;  %s1346_s2 = inlined_call_operand.vmem [shape: f32[1,128], index: 2, kind: input, shape index: {}]   ;;  %s1347_s3 = inlined_call_operand.hbm [shape: f32[2,8,8,128], index: 3, kind: output, shape index: {}]  }
   0x1   :  { %10 = vsyncpa [#allocation4 + $0x1], 0 }
   0x2   :  { %11 = vsyncpa [#allocation7], 0 }
   0x3   :  { %12 = vsyncpa [#allocation5], 0 }
   0x4   :  { %14 = vsyncpa [#allocation5 + $0x1], 0  ;;  %s959_s12 = smov 0   ;;  %s961_s13 = smov 0  }
   0x5   :  { %s963_s14 = smov 0   ;;  %s965_s15 = smov 0  }
   0x6   :  { %s967_s16 = smov 0   ;;  %s969_s17 = smov 0  }
   0x7 LB: > { %s685_s18 = sadd.s32 4294967295, %s929_s17   ;;  %s686_s19 = sadd.s32 4294967294, %s929_s17   ;;  %s929_s17 = sphi %s969_s17, %s20_s17   ;;  %s925_s16 = sphi %s967_s16, %s1371_s16   ;;  %s921_s15 = sphi %s965_s15, %s1370_s15   ;;  %s917_s14 = sphi %s963_s14, %s1369_s14   ;;  %s913_s13 = sphi %s961_s13, %s1368_s13   ;;  %s909_s12 = sphi %s959_s12, %s1367_s12  }
   0x8   : > { %p54_p0 = scmp.ne.s32.totalorder %s913_s13, %s909_s12  ;;  %p993_p1 = scmp.eq.s32.totalorder %s685_s18, 0 }
   0x9   : > { %p997_p2 = scmp.eq.s32.totalorder %s685_s18, 1  ;;  %p138_p3 = scmp.eq.s32.totalorder %s686_s19, 1 }
   0xa   : > { %s1352_s20 = scalar_select %p993_p1, 1, 0 }
   0xb   : > { %s1353_s21 = scalar_select %p997_p2, 1, 0 }
   0xc   : > { %p1003_p4 = por %p993_p1, %p54_p0  ;;  %p687_p5 = scmp.ge.s32.totalorder %s929_s17, 1 }
   0xd   : > { %p1008_p6 = por %p138_p3, %p54_p0  ;;  %p145_p7 = scmp.lt.s32.totalorder %s929_s17, 3 }
   0xe   : > { %s1354_s22 = scalar_select %p1003_p4, 1, 0 }
   0xf   : > { %s1355_s23 = scalar_select %p1008_p6, 1, 0 }
  0x10   : > { %p1013_p8 = pnand %p687_p5, %p145_p7  ;;  %s931_s25 = smov [#allocation6]  }
  0x11   : > { %s159_s26 = sshll.u32 %s931_s25, 4  ;;  %s32_s28 = sadd.s32 1, %s925_s16  ;;  %s160_s26 = int_to_ptr.vmem [resolvable:$true] %s159_s26 }
  0x12   : > { %s1356_s24 = scalar_select %p1013_p8, 1, 0 }
  0x13   : > { %p715_p9 = pneg %p1013_p8  ;;  %s785_s4 = scalar_lea.hbm %s1345_s1, 256 }
  0x14   : > { %p786_p12 = scmp.ne.s32.totalorder %s1345_s1, %s785_s4  ;;  %p792_p5 = scmp.lt.u32.totalorder %s785_s4, %s1345_s1 }
  0x15   : > { %p1022_p11 = pnand %p715_p9, %p993_p1 }
  0x17   : > { %p787_p13 = pneg %p1022_p11 }
  0x19   : > { %p788_p0 = pnand %p787_p13, %p786_p12 }
  0x1b   : > { %p789_p3 = pneg %p788_p0 }
  0x1d   : > { %p794_p7 = pnand %p792_p5, %p789_p3 }
  0x1f   : > { %797 = shalt.err (!%p794_p7)
}
  0x20   : > { %s798_s9 = scalar_lea.vmem %s160_s26, 256  ;;  %p806_p1 = scmp.lt.s32.totalorder %s160_s26, %s160_s26 }
  0x21   : > { %p799_p9 = scmp.ne.s32.totalorder %s160_s26, %s798_s9  ;;  %p807_p4 = scmp.lt.s32.totalorder %s798_s9, %s798_s9 }
  0x23   : > { %p801_p10 = pnand %p799_p9, %p787_p13  ;;  %p808_p8 = por %p807_p4, %p806_p1 }
  0x25   : > { %p802_p6 = pneg %p801_p10 }
  0x27   : > { %p809_p2 = pnand %p808_p8, %p802_p6 }
  0x29   : > { %812 = shalt.err (!%p809_p2)
}
  0x2a   : > { %s932_s10 = smov 128   ;;  %s933_s11 = smov 8  }
  0x2b   : > { %718 = dma.hbm_to_vmem [thread:$0]  (!%p1022_p11), %s1345_s1, 256, %s160_s26, [#allocation7], %s932_s10, %s932_s10, %s933_s11  }
  0x2c   : > { %p34_p1 = scmp.ge.s32.totalorder %s32_s28, 2  ;;  %s41_s25 = sadd.s32 1, %s917_s14 }
  0x2d   : > { %p48_p2 = scmp.ne.s32.totalorder %s917_s14, %s913_s13  ;;  %p49_p4 = scmp.eq.s32.totalorder %s929_s17, 0 }
  0x2e   : > { %s1373_s28 = smov (%p34_p1, %s32_s28), 0  ;;  %p1359_p8 = scmp.ne.s32.totalorder %s1353_s21, 0 }
  0x2f   : > { %p1052_p6 = por %p49_p4, %p48_p2  ;;  %s36_s30 = ssub.s32 %s925_s16, %s1373_s28 }
  0x30   : > { %p1058_p10 = por %p1359_p8, %p48_p2  ;;  %p728_p12 = scmp.lt.s32.totalorder %s929_s17, 2 }
  0x31   : > { %p39_p11 = scmp.eq.s32.totalorder %s36_s30, 0  ;;  %s179_s26 = sand.u32 1, %s917_s14  }
  0x32   : > { %s691_s4 = sshll.u32 %s179_s26, 6  ;;  %s705_s6 = sshll.u32 %s925_s16, 10 }
  0x33   : > { %s1067_s5 = scalar_select %p39_p11, %s917_s14, %s41_s25  }
  0x34   : > { %s1073_s9 = scalar_lea.hbm %s1344_s0, %s705_s6  ;;  %s183_s21 = scalar_lea.vmem [#allocation3], %s691_s4 }
  0x35   : > { %s191_s18 = sshll.u32 %s183_s21, 4  ;;  %p1079_p13 = pnand %p728_p12, %p1052_p6  ;;  %s1075_s18 = int_to_ptr.vmem [resolvable:$true] %s191_s18 }
  0x36   : > { %s1083_s25 = scalar_lea.sflag [#allocation4], %s179_s26  ;;  %s813_s30 = scalar_lea.hbm %s1073_s9, 1024 }
  0x37   : > { %p814_p0 = scmp.ne.s32.totalorder %s1073_s9, %s813_s30  ;;  %p815_p3 = pneg %p1079_p13 }
  0x38   : > { %s818_s29 = scalar_lea.hbm %s1344_s0, 2048  ;;  %p819_p9 = scmp.lt.u32.totalorder %s1073_s9, %s1344_s0 }
  0x39   : > { %p816_p5 = pnand %p815_p3, %p814_p0  ;;  %p820_p1 = scmp.lt.u32.totalorder %s818_s29, %s813_s30 }
  0x3a   : > { %p822_p4 = scmp.lt.u32.totalorder %s813_s30, %s1073_s9 }
  0x3b   : > { %p817_p7 = pneg %p816_p5  ;;  %p821_p2 = por %p820_p1, %p819_p9 }
  0x3d   : > { %p823_p6 = por %p822_p4, %p821_p2 }
  0x3f   : > { %p824_p8 = pnand %p823_p6, %p817_p7 }
  0x41   : > { %827 = shalt.err (!%p824_p8)
}
  0x42   : > { %s828_s26 = scalar_lea.vmem %s1075_s18, 1024  ;;  %s934_s21 = smov [#allocation3]  }
  0x43   : > { %p829_p12 = scmp.ne.s32.totalorder %s1075_s18, %s828_s26  ;;  %s833_s4 = sshll.u32 %s934_s21, 4  ;;  %s834_s4 = int_to_ptr.vmem [resolvable:$false] %s833_s4 }
  0x44   : > { %s835_s6 = scalar_lea.vmem %s834_s4, 2048  ;;  %p836_p5 = scmp.lt.s32.totalorder %s1075_s18, %s834_s4 }
  0x45   : > { %p831_p11 = pnand %p829_p12, %p815_p3  ;;  %p837_p9 = scmp.lt.s32.totalorder %s835_s6, %s828_s26 }
  0x47   : > { %p832_p0 = pneg %p831_p11  ;;  %p838_p1 = por %p837_p9, %p836_p5 }
  0x49   : > { %p839_p2 = pnand %p838_p1, %p832_p0 }
  0x4b   : > { %842 = shalt.err (!%p839_p2)
}
  0x4c   : > { %722 = dma.hbm_to_vmem [thread:$0]  (!%p1079_p13), %s1073_s9, 1024, %s1075_s18, %s1083_s25, %s932_s10, %s932_s10, %s933_s11  }
  0x4d   : > { %p1362_p3 = scmp.ne.s32.totalorder %s1356_s24, 0 }
  0x4e   : > { %s1117_s30 = sand.u32 (!%p1362_p3), 1, %s913_s13   ;;  %p1363_p7 = scmp.ne.s32.totalorder (!%p1362_p3), %s1354_s22, 0 }
  0x4f   : > { %203 = sbr.rel (%p1362_p3) target bundleno = 166 (0xa6), region = 32  ;;  %s695_s29 = sshll.u32 (!%p1362_p3), %s1117_s30, 6 }
  0x50   : > { %s206_s7 = scalar_lea.sflag (!%p1362_p3), [#allocation4], %s1117_s30  ;;  %s1123_s19 = scalar_lea.vmem (!%p1362_p3), [#allocation3], %s695_s29 }
  0x56   : > { %896 = dma.done.wait (%p1363_p7), %s206_s7, 1024  }
  0x57   : > { %898 = vsyncadd (%p1363_p7), %s206_s7, 4294966272  ;;  %p1364_p13 = scmp.ne.s32.totalorder %s1352_s20, 0 }
  0x59   : > { %900 = dma.done.wait (%p1364_p13), [#allocation7], 256  }
  0x5a   : > { %902 = vsyncadd (%p1364_p13), [#allocation7], 4294967040  ;;  %v293_v0 = vlaneseq  ;;  %v935_v1 = vmov 0.0   ;;  %v264_v6 = vld [vmem:[%s1123_s19] sm:$0xff]  ;;  %v265_v7 = vld [vmem:[%s1123_s19 + $0x8] sm:$0xff]  ;;  %s1233_s24 = scalar_lea.vmem [#allocation8], %s695_s29 }
  0x5b   : > { %242 = vst [vmem:[#allocation2] sm:$0xff] %v935_v1  ;;  %243 = vst [vmem:[#allocation2 + $0x8] sm:$0xff] %v935_v1  ;;  %v266_v8 = vld [vmem:[%s1123_s19 + $0x10] sm:$0xff]  ;;  %v267_v11 = vld [vmem:[%s1123_s19 + $0x18] sm:$0xff]  ;;  %s574_s10 = sshll.u32 %s1233_s24, 4  ;;  %s706_s11 = sshll.u32 %s921_s15, 10  ;;  %s1288_s10 = int_to_ptr.vmem [resolvable:$true] %s574_s10 }
  0x5c   : > { %245 = vst [vmem:[#allocation2 + $0x90] sm:$0xff] %v935_v1  ;;  %246 = vst [vmem:[#allocation2 + $0x98] sm:$0xff] %v935_v1  ;;  %v294_v2 = vshrl.u32 %v293_v0, 7  ;;  %v1138_v12 = vld [vmem:[%s1123_s19 + $0x20] sm:$0xff]  ;;  %v1141_v13 = vld [vmem:[%s1123_s19 + $0x28] sm:$0xff]  ;;  %s1293_s25 = scalar_lea.hbm %s1347_s3, %s706_s11  ;;  %s560_s8 = scalar_lea.sflag [#allocation5], %s1117_s30 }
  0x5d   : > { %248 = vst [vmem:[#allocation2 + $0x10] sm:$0x1] %v935_v1  ;;  %249 = vst [vmem:[#allocation2 + $0x20] sm:$0x1] %v935_v1  ;;  %v1146_v15 = vld [vmem:[%s1123_s19 + $0x30] sm:$0xff]  ;;  %v1149_v16 = vld [vmem:[%s1123_s19 + $0x38] sm:$0xff] }
  0x5e   : > { %250 = vst [vmem:[#allocation2 + $0x30] sm:$0x1] %v935_v1  ;;  %251 = vst [vmem:[#allocation2 + $0x40] sm:$0x1] %v935_v1  ;;  %v295_v3 = vsub.s32 0, %v294_v2  ;;  %v315_v4 = vsub.s32 1, %v294_v2 }
  0x5f   : > { %252 = vst [vmem:[#allocation2 + $0x50] sm:$0x1] %v935_v1  ;;  %253 = vst [vmem:[#allocation2 + $0x60] sm:$0x1] %v935_v1  ;;  %v343_v5 = vsub.s32 2, %v294_v2  ;;  %v402_v9 = vsub.s32 4, %v294_v2 }
  0x60   : > { %254 = vst [vmem:[#allocation2 + $0x70] sm:$0x1] %v935_v1  ;;  %255 = vst [vmem:[#allocation2 + $0x80] sm:$0x1] %v935_v1  ;;  %v489_v10 = vsub.s32 7, %v294_v2  ;;  %v374_v14 = vsub.s32 3, %v294_v2 }
  0x61   : > { %256 = vst [vmem:[#allocation2 + $0x19] sm:$0x7f] %v935_v1  ;;  %257 = vst [vmem:[#allocation2 + $0x29] sm:$0x7f] %v935_v1  ;;  %v280_v17 = vld [vmem:[#allocation6] sm:$0xff]  ;;  %v430_v18 = vsub.s32 5, %v294_v2 }
  0x62   : > { %258 = vst [vmem:[#allocation2 + $0x39] sm:$0x7f] %v935_v1  ;;  %259 = vst [vmem:[#allocation2 + $0x49] sm:$0x7f] %v935_v1  ;;  %v461_v19 = vsub.s32 6, %v294_v2  ;;  %v1153_v20 = vrot.slane %v280_v17, %v295_v3  ;;  %v305_v21 = vld [vmem:[#allocation2 + $0x1] sm:$0xff]  ;;  %v1155_v22 = vrot.slane %v280_v17, %v315_v4  ;;  %v1157_v23 = vrot.slane %v280_v17, %v343_v5 }
  0x63   : > { %260 = vst [vmem:[#allocation2 + $0x59] sm:$0x7f] %v935_v1  ;;  %261 = vst [vmem:[#allocation2 + $0x69] sm:$0x7f] %v935_v1  ;;  %v333_v24 = vld [vmem:[#allocation2 + $0x2] sm:$0xff]  ;;  %v1159_v25 = vrot.slane %v280_v17, %v402_v9  ;;  %v1161_v26 = vrot.slane %v280_v17, %v489_v10  ;;  %v1166_v30 = vrot.slane %v280_v17, %v374_v14  ;;  %s843_s26 = scalar_lea.vmem %s1288_s10, 1024 }
  0x64   : > { %262 = vst [vmem:[#allocation2 + $0x79] sm:$0x7f] %v935_v1  ;;  %263 = vst [vmem:[#allocation2 + $0x89] sm:$0x7f] %v935_v1  ;;  %v297_v27 = vmul.f32 0.0, %v1153_v20  ;;  %v317_v28 = vmul.f32 %v1155_v22, %v305_v21  ;;  %v345_v29 = vmul.f32 %v1157_v23, %v333_v24  ;;  %v1168_v31 = vrot.slane %v280_v17, %v430_v18  ;;  %p844_p4 = scmp.ne.s32.totalorder %s1288_s10, %s843_s26  ;;  %s936_s15 = smov [#allocation8]  }
  0x65   : > { %272 = vst [vmem:[#allocation2 + $0x11] sm:$0xff] %v264_v6  ;;  %273 = vst [vmem:[#allocation2 + $0x21] sm:$0xff] %v265_v7  ;;  %v1170_v32 = vrot.slane %v280_v17, %v461_v19  ;;  %v1172_v33 = vld [vmem:[#allocation6 + $0x8] ss:$0 sm:$0xff]  ;;  %v404_v35 = vmul.f32 %v1159_v25, %v264_v6  ;;  %v491_v36 = vmul.f32 %v1161_v26, %v265_v7  ;;  %s847_s21 = sshll.u32 %s936_s15, 4  ;;  %s848_s21 = int_to_ptr.vmem [resolvable:$false] %s847_s21 }
  0x66   : > { %274 = vst [vmem:[#allocation2 + $0x31] sm:$0xff] %v266_v8  ;;  %275 = vst [vmem:[#allocation2 + $0x41] sm:$0xff] %v267_v11  ;;  %v325_v34 = vadd.f32 %v317_v28, %v297_v27  ;;  %v318_v37 = vmul.f32 %v1155_v22, %v264_v6  ;;  %v405_v41 = vmul.f32 %v1159_v25, %v265_v7  ;;  %p845_p6 = pnand %p844_p4, %p1058_p10  ;;  %s849_s4 = scalar_lea.vmem %s848_s21, 2048 }
  0x67   : > { %276 = vst [vmem:[#allocation2 + $0x51] sm:$0xff] %v1138_v12  ;;  %277 = vst [vmem:[#allocation2 + $0x61] sm:$0xff] %v1141_v13  ;;  %v1179_v42 = vmul.f32 %v1161_v26, %v266_v8  ;;  %v319_v43 = vmul.f32 %v1155_v22, %v265_v7  ;;  %v406_v44 = vmul.f32 %v1159_v25, %v266_v8  ;;  %p850_p12 = scmp.lt.s32.totalorder %s1288_s10, %s848_s21  ;;  %p851_p11 = scmp.lt.s32.totalorder %s849_s4, %s843_s26 }
  0x68   : > { %278 = vst [vmem:[#allocation2 + $0x71] sm:$0xff] %v1146_v15  ;;  %279 = vst [vmem:[#allocation2 + $0x81] sm:$0xff] %v1149_v16  ;;  %v353_v45 = vadd.f32 %v345_v29, %v325_v34  ;;  %v1185_v48 = vmul.f32 %v1161_v26, %v267_v11  ;;  %v320_v49 = vmul.f32 %v1155_v22, %v266_v8  ;;  %p846_p8 = pneg %p845_p6 }
  0x69   : > { %v407_v53 = vmul.f32 %v1159_v25, %v267_v11  ;;  %v1192_v54 = vmul.f32 %v1161_v26, %v1138_v12  ;;  %v321_v55 = vmul.f32 %v1155_v22, %v267_v11  ;;  %p852_p0 = por %p851_p11, %p850_p12 }
  0x6b   : > { %p853_p5 = pnand %p852_p0, %p846_p8 }
  0x6c   : > { %v364_v38 = vld [vmem:[#allocation2 + $0x10] sm:$0xff]  ;;  %v451_v40 = vld [vmem:[#allocation2 + $0x20] sm:$0xff] }
  0x6d   : > { %v420_v39 = vld [vmem:[#allocation2 + $0x12] sm:$0xff]  ;;  %v376_v46 = vmul.f32 %v1166_v30, %v364_v38  ;;  %v507_v47 = vld [vmem:[#allocation2 + $0x22] sm:$0xff]  ;;  %v298_v50 = vmul.f32 %v364_v38, %v1153_v20  ;;  %v463_v58 = vmul.f32 %v1170_v32, %v451_v40  ;;  %v377_v62 = vmul.f32 %v451_v40, %v1166_v30 }
  0x6e   : > { %v452_v51 = vld [vmem:[#allocation2 + $0x30] sm:$0xff]  ;;  %v432_v57 = vmul.f32 %v1168_v31, %v420_v39  ;;  %v519_v59 = vmul.f32 %v1172_v33, %v507_v47  ;;  %v346_v61 = vmul.f32 %v420_v39, %v1157_v23  ;;  %v299_v63 = vmul.f32 %v451_v40, %v1153_v20  ;;  %v453_v0 = vld [vmem:[#allocation2 + $0x40] sm:$0xff] }
  0x6f   : > { %v508_v52 = vld [vmem:[#allocation2 + $0x32] sm:$0xff]  ;;  %v384_v56 = vadd.f32 %v376_v46, %v353_v45  ;;  %v326_v60 = vadd.f32 %v318_v37, %v298_v50  ;;  %v433_v2 = vmul.f32 %v507_v47, %v1168_v31  ;;  %v464_v3 = vmul.f32 %v1170_v32, %v452_v51  ;;  %v509_v8 = vld [vmem:[#allocation2 + $0x42] sm:$0xff] }
  0x70   : > { %v520_v4 = vmul.f32 %v1172_v33, %v508_v52  ;;  %v327_v6 = vadd.f32 %v319_v43, %v299_v63  ;;  %v347_v7 = vmul.f32 %v507_v47, %v1157_v23  ;;  %v300_v9 = vmul.f32 %v452_v51, %v1153_v20  ;;  %v454_v27 = vld [vmem:[#allocation2 + $0x50] sm:$0xff]  ;;  %v455_v63 = vld [vmem:[#allocation2 + $0x60] sm:$0xff] }
  0x71   : > { %v412_v1 = vadd.f32 %v404_v35, %v384_v56  ;;  %v354_v5 = vadd.f32 %v346_v61, %v326_v60  ;;  %v378_v11 = vmul.f32 %v452_v51, %v1166_v30  ;;  %v434_v14 = vmul.f32 %v508_v52, %v1168_v31  ;;  %v510_v56 = vld [vmem:[#allocation2 + $0x52] sm:$0xff] }
  0x72   : > { %v465_v17 = vmul.f32 %v1170_v32, %v453_v0  ;;  %v355_v19 = vadd.f32 %v347_v7, %v327_v6  ;;  %v328_v21 = vadd.f32 %v320_v49, %v300_v9  ;;  %v348_v24 = vmul.f32 %v508_v52, %v1157_v23  ;;  %v1219_v49 = vld [vmem:[%s1346_s2] ss:$0 sm:$0xff] }
  0x73   : > { %v440_v10 = vadd.f32 %v432_v57, %v412_v1  ;;  %v385_v18 = vadd.f32 %v377_v62, %v354_v5  ;;  %v521_v29 = vmul.f32 %v1172_v33, %v509_v8  ;;  %v379_v34 = vmul.f32 %v453_v0, %v1166_v30 }
  0x74   : > { %v301_v35 = vmul.f32 %v453_v0, %v1153_v20  ;;  %v386_v38 = vadd.f32 %v378_v11, %v355_v19  ;;  %v356_v39 = vadd.f32 %v348_v24, %v328_v21  ;;  %v435_v40 = vmul.f32 %v509_v8, %v1168_v31  ;;  %v456_v24 = vld [vmem:[#allocation2 + $0x70] sm:$0xff] }
  0x75   : > { %v471_v28 = vadd.f32 %v463_v58, %v440_v10  ;;  %v413_v37 = vadd.f32 %v405_v41, %v385_v18  ;;  %v466_v45 = vmul.f32 %v1170_v32, %v454_v27  ;;  %v349_v47 = vmul.f32 %v509_v8, %v1157_v23 }
  0x76   : > { %v329_v46 = vadd.f32 %v321_v55, %v301_v35  ;;  %v414_v51 = vadd.f32 %v406_v44, %v386_v38  ;;  %v387_v52 = vadd.f32 %v379_v34, %v356_v39  ;;  %v380_v41 = vmul.f32 %v454_v27, %v1166_v30 }
  0x77   : > { %v499_v43 = vadd.f32 %v491_v36, %v471_v28  ;;  %v441_v50 = vadd.f32 %v433_v2, %v413_v37  ;;  %v408_v36 = vmul.f32 %v1159_v25, %v1138_v12  ;;  %v302_v55 = vmul.f32 %v454_v27, %v1153_v20 }
  0x78   : > { %v357_v58 = vadd.f32 %v349_v47, %v329_v46  ;;  %v442_v61 = vadd.f32 %v434_v14, %v414_v51  ;;  %v415_v62 = vadd.f32 %v407_v53, %v387_v52  ;;  %v322_v0 = vmul.f32 %v1155_v22, %v1138_v12  ;;  %v511_v14 = vld [vmem:[#allocation2 + $0x62] sm:$0xff]  ;;  %v512_v47 = vld [vmem:[#allocation2 + $0x72] sm:$0xff] }
  0x79   : > { %v527_v57 = vadd.f32 %v519_v59, %v499_v43  ;;  %v472_v60 = vadd.f32 %v464_v3, %v441_v50  ;;  %v522_v1 = vmul.f32 %v1172_v33, %v510_v56  ;;  %v350_v59 = vmul.f32 %v510_v56, %v1157_v23 }
  0x7a   : > { %v388_v2 = vadd.f32 %v380_v41, %v357_v58  ;;  %v473_v6 = vadd.f32 %v465_v17, %v442_v61  ;;  %v443_v7 = vadd.f32 %v435_v40, %v415_v62  ;;  %v330_v8 = vadd.f32 %v322_v0, %v302_v55 }
  0x7b   : > { %v541_v44 = vadd.f32 %v1219_v49, %v527_v57  ;;  %v500_v5 = vadd.f32 %v1179_v42, %v472_v60  ;;  %v436_v12 = vmul.f32 %v510_v56, %v1168_v31  ;;  %v381_v3 = vmul.f32 %v455_v63, %v1166_v30  ;;  %v457_v57 = vld [vmem:[#allocation2 + $0x80] sm:$0xff] }
  0x7c   : > { %v416_v53 = vadd.f32 %v408_v36, %v388_v2  ;;  %v409_v9 = vmul.f32 %v1159_v25, %v1141_v13  ;;  %v501_v11 = vadd.f32 %v1185_v48, %v473_v6  ;;  %v474_v42 = vadd.f32 %v466_v45, %v443_v7 }
  0x7d   : > { %551 = vst [vmem:[%s1233_s24] sm:$0xff] %v541_v44  ;;  %v528_v10 = vadd.f32 %v520_v4, %v500_v5  ;;  %v358_v17 = vadd.f32 %v350_v59, %v330_v8  ;;  %v467_v19 = vmul.f32 %v1170_v32, %v455_v63  ;;  %v495_v21 = vmul.f32 %v1161_v26, %v1141_v13 }
  0x7e   : > { %v444_v18 = vadd.f32 %v436_v12, %v416_v53  ;;  %v303_v27 = vmul.f32 %v455_v63, %v1153_v20  ;;  %v529_v34 = vadd.f32 %v521_v29, %v501_v11  ;;  %v502_v4 = vadd.f32 %v1192_v54, %v474_v42 }
  0x7f   : > { %v542_v28 = vadd.f32 %v1219_v49, %v528_v10  ;;  %v389_v48 = vadd.f32 %v381_v3, %v358_v17  ;;  %v523_v37 = vmul.f32 %v1172_v33, %v511_v14  ;;  %v437_v38 = vmul.f32 %v511_v14, %v1168_v31  ;;  %v486_v3 = vld [vmem:[#allocation2 + $0x91] sm:$0xff] }
  0x80   : > { %v475_v35 = vadd.f32 %v467_v19, %v444_v18  ;;  %v323_v39 = vmul.f32 %v1155_v22, %v1141_v13  ;;  %v543_v40 = vadd.f32 %v1219_v49, %v529_v34  ;;  %v530_v43 = vadd.f32 %v522_v1, %v502_v4  ;;  %v514_v18 = vld [vmem:[#allocation2 + $0x92] sm:$0xff] }
  0x81   : > { %552 = vst [vmem:[%s1233_s24 + $0x8] sm:$0xff] %v542_v28  ;;  %v417_v45 = vadd.f32 %v409_v9, %v389_v48  ;;  %v468_v46 = vmul.f32 %v1170_v32, %v456_v24  ;;  %v496_v54 = vmul.f32 %v1161_v26, %v1146_v15  ;;  %v351_v51 = vmul.f32 %v511_v14, %v1157_v23 }
  0x82   : > { %v503_v29 = vadd.f32 %v495_v21, %v475_v35  ;;  %v331_v50 = vadd.f32 %v323_v39, %v303_v27  ;;  %553 = vst [vmem:[%s1233_s24 + $0x10] sm:$0xff] %v543_v40  ;;  %v544_v52 = vadd.f32 %v1219_v49, %v530_v43  ;;  %v382_v56 = vmul.f32 %v456_v24, %v1166_v30 }
  0x83   : > { %v445_v13 = vadd.f32 %v437_v38, %v417_v45  ;;  %v410_v41 = vmul.f32 %v1159_v25, %v1146_v15  ;;  %v304_v55 = vmul.f32 %v456_v24, %v1153_v20  ;;  %v324_v60 = vmul.f32 %v1155_v22, %v1146_v15 }
  0x84   : > { %v531_v58 = vadd.f32 %v523_v37, %v503_v29  ;;  %v359_v36 = vadd.f32 %v351_v51, %v331_v50  ;;  %554 = vst [vmem:[%s1233_s24 + $0x18] sm:$0xff] %v544_v52  ;;  %v352_v62 = vmul.f32 %v512_v47, %v1157_v23  ;;  %v383_v1 = vmul.f32 %v457_v57, %v1166_v30  ;;  %v513_v23 = vld [vmem:[#allocation2 + $0x82] sm:$0xff] }
  0x85   : > { %v476_v61 = vadd.f32 %v468_v46, %v445_v13  ;;  %v332_v44 = vadd.f32 %v324_v60, %v304_v55  ;;  %v524_v59 = vmul.f32 %v1172_v33, %v512_v47  ;;  %v438_v20 = vmul.f32 %v512_v47, %v1168_v31 }
  0x86   : > { %v545_v63 = vadd.f32 %v1219_v49, %v531_v58  ;;  %v390_v0 = vadd.f32 %v382_v56, %v359_v36  ;;  %v411_v15 = vmul.f32 %v1159_v25, %v1149_v16  ;;  %v469_v8 = vmul.f32 %v1170_v32, %v457_v57 }
  0x87   : > { %v504_v2 = vadd.f32 %v496_v54, %v476_v61  ;;  %v360_v6 = vadd.f32 %v352_v62, %v332_v44  ;;  %v497_v30 = vmul.f32 %v1161_v26, %v1149_v16  ;;  %v439_v11 = vmul.f32 %v513_v23, %v1168_v31 }
  0x88   : > { %555 = vst [vmem:[%s1233_s24 + $0x20] sm:$0xff] %v545_v63  ;;  %v418_v5 = vadd.f32 %v410_v41, %v390_v0  ;;  %v470_v25 = vmul.f32 0.0, %v1170_v32  ;;  %v525_v14 = vmul.f32 %v1172_v33, %v513_v23  ;;  %v498_v16 = vmul.f32 %v1161_v26, %v486_v3 }
  0x89   : > { %v532_v22 = vadd.f32 %v524_v59, %v504_v2  ;;  %v391_v53 = vadd.f32 %v383_v1, %v360_v6  ;;  %v526_v31 = vmul.f32 %v1172_v33, %v514_v18 }
  0x8a   : > { %v446_v7 = vadd.f32 %v438_v20, %v418_v5 }
  0x8b   : > { %v546_v12 = vadd.f32 %v1219_v49, %v532_v22  ;;  %v419_v10 = vadd.f32 %v411_v15, %v391_v53 }
  0x8c   : > { %v477_v9 = vadd.f32 %v469_v8, %v446_v7 }
  0x8d   : > { %556 = vst [vmem:[%s1233_s24 + $0x28] sm:$0xff] %v546_v12  ;;  %v447_v17 = vadd.f32 %v439_v11, %v419_v10 }
  0x8e   : > { %v505_v42 = vadd.f32 %v497_v30, %v477_v9 }
  0x8f   : > { %v478_v21 = vadd.f32 %v470_v25, %v447_v17 }
  0x90   : > { %v533_v19 = vadd.f32 %v525_v14, %v505_v42 }
  0x91   : > { %v506_v27 = vadd.f32 %v498_v16, %v478_v21 }
  0x92   : > { %v547_v24 = vadd.f32 %v1219_v49, %v533_v19 }
  0x93   : > { %v534_v32 = vadd.f32 %v526_v31, %v506_v27 }
  0x94   : > { %557 = vst [vmem:[%s1233_s24 + $0x30] sm:$0xff] %v547_v24 }
  0x95   : > { %v548_v26 = vadd.f32 %v1219_v49, %v534_v32 }
  0x97   : > { %558 = vst [vmem:[%s1233_s24 + $0x38] sm:$0xff] %v548_v26 }
  0x98   : > { %856 = shalt.err (!%p853_p5)
}
  0x99   : > { %s857_s6 = scalar_lea.hbm %s1293_s25, 1024  ;;  %s861_s19 = scalar_lea.hbm %s1347_s3, 2048 }
  0x9a   : > { %p858_p9 = scmp.ne.s32.totalorder %s1293_s25, %s857_s6  ;;  %p862_p3 = scmp.lt.u32.totalorder %s1293_s25, %s1347_s3 }
  0x9b   : > { %p863_p7 = scmp.lt.u32.totalorder %s861_s19, %s857_s6  ;;  %p865_p4 = scmp.lt.u32.totalorder %s857_s6, %s1293_s25 }
  0x9c   : > { %p859_p1 = pnand %p858_p9, %p1058_p10 }
  0x9d   : > { %p864_p13 = por %p863_p7, %p862_p3 }
  0x9e   : > { %p860_p2 = pneg %p859_p1 }
  0x9f   : > { %p866_p6 = por %p865_p4, %p864_p13 }
  0xa1   : > { %p867_p8 = pnand %p866_p6, %p860_p2 }
  0xa3   : > { %870 = shalt.err (!%p867_p8)
}
  0xa4   : > { %s937_s24 = smov 128   ;;  %s938_s11 = smov 8  }
  0xa5   : > { %713 = dma.vmem_to_hbm [thread:$0]  (%p1058_p10), %s1288_s10, 1024, %s1293_s25, %s560_s8, %s937_s24, %s937_s24, %s938_s11  }
  0xa6 PF: > { %s589_s9 = sand.u32 1, %s909_s12   ;;  %p1365_p12 = scmp.ne.s32.totalorder %s1355_s23, 0 }
  0xa7   : > { %p1366_p11 = scmp.ge.s32.totalorder %s929_s17, 2  ;;  %s590_s18 = scalar_lea.sflag [#allocation5], %s589_s9 }
  0xa9   : > { %p724_p0 = pnand %p1366_p11, %p1365_p12 }
  0xab   : > { %904 = dma.done.wait (!%p724_p0), %s590_s18, 1024  }
  0xac   : > { %906 = vsyncadd (!%p724_p0), %s590_s18, 4294966272  ;;  %s20_s17 = sadd.s32 1, %s929_s17   ;;  %s1367_s12 = smov %s913_s13 }
  0xad   : > { %p17_p5 = scmp.ge.s32.totalorder %s20_s17, 4   ;;  %s1368_s13 = smov %s917_s14 }
  0xae   : > { %s1369_s14 = smov %s1067_s5  ;;  %s1370_s15 = smov %s925_s16 }
  0xaf   : > { %s1371_s16 = smov %s1373_s28  ;;  %19 = sbr.rel (!%p17_p5) target bundleno = 7 (0x7), region = 91 }
  0xb6   :  { %595 = vsyncpa [#allocation4], 1 }
  0xb7   :  { %597 = vsyncpa [#allocation4 + $0x1], 1 }
  0xb8   :  { %598 = vsyncpa [#allocation7], 1 }
  0xb9   :  { %599 = vsyncpa [#allocation5], 1 }
  0xba   :  { %601 = vsyncpa [#allocation5 + $0x1], 1 }

</bundles_post_ra>
